<compile_context>
chip_gen: v7x
topology: tpu7x:2x2x1
jax: 0.10.0
libtpu: 0.0.40
codegen_flags: <defaults>
</compile_context>

<pallas_src>
import jax
import jax.numpy as jnp
from jax import lax
from jax.experimental import pallas as pl
from jax.experimental.pallas import tpu as pltpu

# ---------------- small config consistent with BatchIdentNet ----------------
BATCH = 8
NPOINTS = 16
D_FEAT = 4
D_LAB = 3
NMOMENTS = [8, 8]          # parameters['nmoments']  (last entry feeds the FC stack)
FC_METAFEATURES = [32, 16] # parameters['fc_metafeatures']
# config used here: skip_connection=False, use_batchnorm=False, dropout_fc=[0.0]
# (eval-mode semantics: Dropout == identity, no BatchNorm; torch's train=True only
#  toggles BN/Dropout modes, which are inert in this config)


# ------------------------------- fused kernel --------------------------------
def _batch_ident_kernel(x1_ref, x2_ref, w0_ref, b0_ref, w1_ref, b1_ref, out_ref):
    """Fused siamese forward: both Extractor branches + head in one kernel.

    x1_ref/x2_ref : (B, npoints*d_feat) f32
    w0            : (nmoments[-1], fc0)   b0 : (1, fc0)
    w1            : (fc0, fc1)            b1 : (1, fc1)
    out_ref       : (B, 2)  rows are [s, 1-s]
    """
    b = x1_ref.shape[0]
    npts_feat = x1_ref.shape[1]
    nmom = w0_ref.shape[0]

    # Shared siamese branch: stack the two inputs on the sublane (batch) axis so
    # the extractor runs once on a (2B, P) tile (B=8 is a full f32 sublane group,
    # so the concat is a clean tile-boundary placement).
    x = jnp.concatenate([x1_ref[...], x2_ref[...]], axis=0)          # (2B, P)

    # TODO(synk): the EB / EB_variable moment-embedding blocks are not defined in
    # the reference source; deterministic statistical moments over the flattened
    # points stand in for the learned extractor producing the (2B, nmoments[-1]) z.
    # Running-product powers (no integer_pow re-derivation per order).
    # NOTE: mean(x**nmom) in f32 can lose precision for |x| >> 2; fine for N(0,1).
    pows = [x]
    p = x
    for _ in range(nmom - 1):
        p = p * x
        pows.append(p)
    # Stack along a new LEADING axis (no relayout of the (2B, P) tiles) and reduce
    # the lane axis once instead of nmom separate (B,1) reductions + lane concat.
    pstack = jnp.stack(pows, axis=0)                                 # (nmom, 2B, P)
    zsum = jnp.sum(pstack, axis=-1)                                  # (nmom, 2B)
    inv_p = 1.0 / npts_feat

    # fc_metafeatures stack: Linear -> ReLU -> Linear (Dropout identity in eval,
    # use_batchnorm=False in this config).  The 1/P mean scale is folded into the
    # first matmul; contracting dim 0 of zsum (== z.T layout) avoids a transpose.
    h = lax.dot_general(zsum, w0_ref[...], (((0,), (0,)), ((), ())),
                        preferred_element_type=jnp.float32)          # (2B, fc0)
    h = jnp.maximum(h * inv_p + b0_ref[...], 0.0)
    z = jnp.dot(h, w1_ref[...],
                preferred_element_type=jnp.float32) + b1_ref[...]    # (2B, fc1)

    # Siamese head (z1/z2 never leave vregs):
    # diff=|z1-z2|; s=exp(-||diff||_2 over dim 1, keepdim); out=cat([s, 1-s], 1).
    z1 = z[:b]
    z2 = z[b:]
    d = jnp.abs(z1 - z2)
    nrm = jnp.sqrt(jnp.sum(d * d, axis=1, keepdims=True))            # (B, 1)
    s = jnp.exp(-nrm)
    out_ref[...] = jnp.concatenate([s, 1.0 - s], axis=1)             # (B, 2)


# ------------------------------- wrapper --------------------------------------
_VMEM = pl.BlockSpec(memory_space=pltpu.MemorySpace.VMEM)


def batch_ident_forward(params, x1, lab1, info1, x2, lab2, info2, train=False):
    # lab/info feed only the (unavailable) EB_variable block; train only toggles
    # BN/Dropout modes in torch (inert in this config) -- see TODO in the kernel.
    del lab1, info1, lab2, info2, train
    b = x1.shape[0]
    x1_2d = x1.reshape(b, -1).astype(jnp.float32)
    x2_2d = x2.reshape(b, -1).astype(jnp.float32)
    # Single fused call, no grid: the whole problem is a few KB, so launch/DMA
    # overhead dominates.  (If many pairs / a large batch were run, add a grid
    # over the batch axis with dimension_semantics=("parallel",) so both v7x
    # TensorCores get work -- moot at this size.)
    return pl.pallas_call(
        _batch_ident_kernel,
        out_shape=jax.ShapeDtypeStruct((b, 2), jnp.float32),
        in_specs=[_VMEM] * 6,
        out_specs=_VMEM,
    )(x1_2d, x2_2d, params["w0"], params["b0"], params["w1"], params["b1"])


def init_params(key):
    nmom = NMOMENTS[-1]
    f0, f1 = FC_METAFEATURES
    k0, k1, k2, k3 = jax.random.split(key, 4)
    # nn.Linear-style deterministic init (stored transposed: (in, out))
    w0 = jax.random.uniform(k0, (nmom, f0), jnp.float32, -1.0, 1.0) / jnp.sqrt(nmom)
    b0 = jax.random.uniform(k1, (1, f0), jnp.float32, -1.0, 1.0) / jnp.sqrt(nmom)
    w1 = jax.random.uniform(k2, (f0, f1), jnp.float32, -1.0, 1.0) / jnp.sqrt(f0)
    b1 = jax.random.uniform(k3, (1, f1), jnp.float32, -1.0, 1.0) / jnp.sqrt(f0)
    return {"w0": w0, "b0": b0, "w1": w1, "b1": b1}


def _reference_forward(params, x1, x2):
    """Pure-JAX reference of the same (eval-mode) forward, for a sanity check."""
    hp = jax.lax.Precision.HIGHEST

    def extract(x):
        xf = x.reshape(x.shape[0], -1).astype(jnp.float32)
        z = jnp.stack([jnp.mean(xf ** (k + 1), axis=1)
                       for k in range(NMOMENTS[-1])], axis=1)
        h = jnp.maximum(jnp.dot(z, params["w0"], precision=hp) + params["b0"], 0.0)
        return jnp.dot(h, params["w1"], precision=hp) + params["b1"]

    z1, z2 = extract(x1), extract(x2)
    d = jnp.abs(z1 - z2)
    s = jnp.exp(-jnp.sqrt(jnp.sum(d * d, axis=1, keepdims=True)))
    return jnp.concatenate([s, 1.0 - s], axis=1)


if __name__ == "__main__":
    key = jax.random.PRNGKey(0)
    kp, kx1, kx2, kl1, kl2 = jax.random.split(key, 5)
    params = init_params(kp)

    x1 = jax.random.normal(kx1, (BATCH, NPOINTS, D_FEAT), jnp.float32)
    x2 = jax.random.normal(kx2, (BATCH, NPOINTS, D_FEAT), jnp.float32)
    lab1 = jax.random.normal(kl1, (BATCH, NPOINTS, D_LAB), jnp.float32)
    lab2 = jax.random.normal(kl2, (BATCH, NPOINTS, D_LAB), jnp.float32)
    info1 = jnp.zeros((BATCH, 1), jnp.float32)
    info2 = jnp.zeros((BATCH, 1), jnp.float32)

    out = jax.jit(batch_ident_forward)(params, x1, lab1, info1, x2, lab2, info2)
    out = jax.block_until_ready(out)

    assert out.shape == (BATCH, 2) and out.dtype == jnp.float32
    # rows are [s, 1-s]: they must sum to 1
    assert bool(jnp.allclose(jnp.sum(out, axis=1), 1.0, atol=1e-5))
    # fused kernel must match the unfused pure-JAX reference
    ref = _reference_forward(params, x1, x2)
    assert bool(jnp.allclose(out, ref, atol=1e-2, rtol=1e-2))
    print("KERNEL_OK")
</pallas_src>

<mosaic_0001>
module attributes {stable_mosaic.version = 11 : i64} {
  func.func @_batch_ident_kernel(%arg0: memref<8x64xf32, #tpu.memory_space<vmem>>, %arg1: memref<8x64xf32, #tpu.memory_space<vmem>>, %arg2: memref<8x32xf32, #tpu.memory_space<vmem>>, %arg3: memref<1x32xf32, #tpu.memory_space<vmem>>, %arg4: memref<32x16xf32, #tpu.memory_space<vmem>>, %arg5: memref<1x16xf32, #tpu.memory_space<vmem>>, %arg6: memref<8x2xf32, #tpu.memory_space<vmem>>) attributes {dimension_semantics = [], scalar_prefetch = 0 : i64, scratch_operands = 0 : i64, tpu.core_type = #tpu.core_type<tc>} {
    %c0 = arith.constant 0 : index
    %c0_0 = arith.constant 0 : index
    %0 = vector.load %arg0[%c0, %c0_0] : memref<8x64xf32, #tpu.memory_space<vmem>>, vector<8x64xf32>
    %c0_1 = arith.constant 0 : index
    %c0_2 = arith.constant 0 : index
    %1 = vector.load %arg1[%c0_1, %c0_2] : memref<8x64xf32, #tpu.memory_space<vmem>>, vector<8x64xf32>
    %2 = tpu.concatenate %0, %1 in 0 : vector<8x64xf32>, vector<8x64xf32> -> vector<16x64xf32>
    %3 = arith.mulf %2, %2 : vector<16x64xf32>
    %4 = arith.mulf %3, %2 : vector<16x64xf32>
    %5 = arith.mulf %4, %2 : vector<16x64xf32>
    %6 = arith.mulf %5, %2 : vector<16x64xf32>
    %7 = arith.mulf %6, %2 : vector<16x64xf32>
    %8 = arith.mulf %7, %2 : vector<16x64xf32>
    %9 = arith.mulf %8, %2 : vector<16x64xf32>
    %10 = vector.shape_cast %2 : vector<16x64xf32> to vector<1x16x64xf32>
    %11 = vector.shape_cast %3 : vector<16x64xf32> to vector<1x16x64xf32>
    %12 = vector.shape_cast %4 : vector<16x64xf32> to vector<1x16x64xf32>
    %13 = vector.shape_cast %5 : vector<16x64xf32> to vector<1x16x64xf32>
    %14 = vector.shape_cast %6 : vector<16x64xf32> to vector<1x16x64xf32>
    %15 = vector.shape_cast %7 : vector<16x64xf32> to vector<1x16x64xf32>
    %16 = vector.shape_cast %8 : vector<16x64xf32> to vector<1x16x64xf32>
    %17 = vector.shape_cast %9 : vector<16x64xf32> to vector<1x16x64xf32>
    %18 = tpu.concatenate %10, %11, %12, %13, %14, %15, %16, %17 in 0 : vector<1x16x64xf32>, vector<1x16x64xf32>, vector<1x16x64xf32>, vector<1x16x64xf32>, vector<1x16x64xf32>, vector<1x16x64xf32>, vector<1x16x64xf32>, vector<1x16x64xf32> -> vector<8x16x64xf32>
    %cst = arith.constant dense<0.000000e+00> : vector<8x16xf32>
    %19 = vector.multi_reduction <add>, %18, %cst [2] : vector<8x16x64xf32> to vector<8x16xf32>
    %c0_3 = arith.constant 0 : index
    %c0_4 = arith.constant 0 : index
    %20 = vector.load %arg2[%c0_3, %c0_4] : memref<8x32xf32, #tpu.memory_space<vmem>>, vector<8x32xf32>
    %cst_5 = arith.constant dense<0.000000e+00> : vector<16x32xf32>
    %21 = tpu.matmul %19, %20, %cst_5 {dimension_numbers = #tpu.dot_dimension_numbers<[0], [0], [1], [1], [0, 1, 1, 1], [], []>} : vector<8x16xf32>, vector<8x32xf32>, vector<16x32xf32> -> vector<16x32xf32>
    %cst_6 = arith.constant 1.562500e-02 : f32
    %22 = vector.broadcast %cst_6 : f32 to vector<16x32xf32>
    %23 = arith.mulf %21, %22 : vector<16x32xf32>
    %c0_7 = arith.constant 0 : index
    %c0_8 = arith.constant 0 : index
    %24 = vector.load %arg3[%c0_7, %c0_8] : memref<1x32xf32, #tpu.memory_space<vmem>>, vector<1x32xf32>
    %25 = vector.broadcast %24 : vector<1x32xf32> to vector<16x32xf32>
    %26 = arith.addf %23, %25 : vector<16x32xf32>
    %cst_9 = arith.constant 0.000000e+00 : f32
    %27 = vector.broadcast %cst_9 : f32 to vector<16x32xf32>
    %28 = arith.maximumf %26, %27 : vector<16x32xf32>
    %c0_10 = arith.constant 0 : index
    %c0_11 = arith.constant 0 : index
    %29 = vector.load %arg4[%c0_10, %c0_11] : memref<32x16xf32, #tpu.memory_space<vmem>>, vector<32x16xf32>
    %cst_12 = arith.constant dense<0.000000e+00> : vector<16x16xf32>
    %30 = tpu.matmul %28, %29, %cst_12 {dimension_numbers = #tpu.dot_dimension_numbers<[1], [0], [0], [1], [0, 0, 1, 1], [], []>} : vector<16x32xf32>, vector<32x16xf32>, vector<16x16xf32> -> vector<16x16xf32>
    %c0_13 = arith.constant 0 : index
    %c0_14 = arith.constant 0 : index
    %31 = vector.load %arg5[%c0_13, %c0_14] : memref<1x16xf32, #tpu.memory_space<vmem>>, vector<1x16xf32>
    %32 = vector.broadcast %31 : vector<1x16xf32> to vector<16x16xf32>
    %33 = arith.addf %30, %32 : vector<16x16xf32>
    %34 = vector.extract_strided_slice %33 {offsets = [0, 0], sizes = [8, 16], strides = [1, 1]} : vector<16x16xf32> to vector<8x16xf32>
    %35 = vector.extract_strided_slice %33 {offsets = [8, 0], sizes = [8, 16], strides = [1, 1]} : vector<16x16xf32> to vector<8x16xf32>
    %36 = arith.subf %34, %35 : vector<8x16xf32>
    %37 = math.absf %36 : vector<8x16xf32>
    %38 = arith.mulf %37, %37 : vector<8x16xf32>
    %cst_15 = arith.constant dense<0.000000e+00> : vector<8xf32>
    %39 = vector.multi_reduction <add>, %38, %cst_15 [1] : vector<8x16xf32> to vector<8xf32>
    %40 = vector.shape_cast %39 : vector<8xf32> to vector<8x1xf32>
    %41 = math.sqrt %40 : vector<8x1xf32>
    %cst_16 = arith.constant 0.000000e+00 : f32
    %42 = vector.broadcast %cst_16 : f32 to vector<8x1xf32>
    %43 = arith.subf %42, %41 : vector<8x1xf32>
    %44 = math.exp %43 : vector<8x1xf32>
    %cst_17 = arith.constant 1.000000e+00 : f32
    %45 = vector.broadcast %cst_17 : f32 to vector<8x1xf32>
    %46 = arith.subf %45, %44 : vector<8x1xf32>
    %47 = tpu.concatenate %44, %46 in 1 : vector<8x1xf32>, vector<8x1xf32> -> vector<8x2xf32>
    %c0_18 = arith.constant 0 : index
    %c0_19 = arith.constant 0 : index
    %48 = vector.load %arg6[%c0_18, %c0_19] : memref<8x2xf32, #tpu.memory_space<vmem>>, vector<8x2xf32>
    tpu.vector_store %arg6[%c0_18, %c0_19], %47 {strides = array<i32>} : memref<8x2xf32, #tpu.memory_space<vmem>>, vector<8x2xf32>,
    return
  }
}

</mosaic_0001>

<bundles_post_ra>
// kernel: batch_ident_forward.1
= control target key start
LH: loop header
LB: loop body
LE: loop exit
PB: predicated region body
PF: predicated region fallthrough
CT: control target
= control target key end

     0   :  { %vm39_vm0 = vcmask 523264   ;;  %v105_v36 = vlaneseq  ;;  %vm116_vm1 = vcmask 130112   ;;  %vm181_vm2 = vcmask 1041409   ;;  %s576_s0 = inlined_call_operand.vmem [shape: f32[8,64], index: 0, kind: input, shape index: {}]   ;;  %s577_s1 = inlined_call_operand.vmem [shape: f32[8,64], index: 1, kind: input, shape index: {}]   ;;  %s578_s2 = inlined_call_operand.vmem [shape: f32[8,32], index: 2, kind: input, shape index: {}]   ;;  %s579_s4 = inlined_call_operand.vmem [shape: f32[32,16], index: 4, kind: input, shape index: {}]   ;;  %s580_s3 = inlined_call_operand.vmem [shape: f32[1,32], index: 3, kind: input, shape index: {}]   ;;  %s581_s5 = inlined_call_operand.vmem [shape: f32[1,16], index: 5, kind: input, shape index: {}]   ;;  %s582_s6 = inlined_call_operand.vmem [shape: f32[8,2], index: 6, kind: output, shape index: {}]  }
   0x1   :  { %v23_v0 = vld [vmem:[%s576_s0] sm:$0xff]  ;;  %vm183_vm3 = vcmask 1042434   ;;  %vm185_vm4 = vcmask 1043459   ;;  %vm187_vm5 = vcmask 1044484   ;;  %vm189_vm6 = vcmask 1045509  }
   0x2   :  { %v24_v1 = vld [vmem:[%s577_s1] sm:$0xff]  ;;  %v40_v2 = vsel %vm39_vm0, %v23_v0, 0.0  ;;  %v25_v3 = vmul.f32 %v23_v0, %v23_v0  ;;  %v106_v39 = vand.u32 127, %v105_v36  ;;  %v108_v42 = vshrl.u32 %v105_v36, 7 }
   0x3   :  { %v26_v4 = vmul.f32 %v24_v1, %v24_v1  ;;  %41 = vadd.xlane.f32.xlu0 %v40_v2  ;;  %v43_v6 = vsel %vm39_vm0, %v24_v1, 0.0  ;;  %vm191_vm7 = vcmask 1046534   ;;  %vm193_vm8 = vcmask 1047559  }
   0x4   :  { %v46_v5 = vsel %vm39_vm0, %v25_v3, 0.0  ;;  %v27_v7 = vmul.f32 %v25_v3, %v23_v0  ;;  %v111_v43 = vadd.s32 4294967288, %v106_v39  ;;  %v109_v46 = vsub.s32 %v106_v39, %v108_v42  ;;  %v445_v39 = vld [vmem:[%s581_s5] ss:$0 sm:$0xff] }
   0x5   :  { %47 = vadd.xlane.f32.xlu1 %v46_v5  ;;  %v49_v8 = vsel %vm39_vm0, %v26_v4, 0.0  ;;  %v28_v9 = vmul.f32 %v26_v4, %v24_v1  ;;  %vm228_vm9 = vcmask 64512   ;;  %vm334_vm10 = vcmask 261120  }
   0x6   :  { %v52_v10 = vsel %vm39_vm0, %v27_v7, 0.0  ;;  %v29_v11 = vmul.f32 %v27_v7, %v23_v0  ;;  %v114_v47 = vsub.s32 %v111_v43, %v108_v42  ;;  %vm419_vm11 = vcmask 130048  }
   0x7   :  { %44 = vadd.xlane.f32.xlu0 %v43_v6  ;;  %v55_v12 = vsel %vm39_vm0, %v28_v9, 0.0  ;;  %v30_v13 = vmul.f32 %v28_v9, %v24_v1  ;;  %vm434_vm14 = vcmask 7168   ;;  %vm436_vm15 = vcmask 15360  }
   0x8   :  { %v58_v14 = vsel %vm39_vm0, %v29_v11, 0.0  ;;  %v31_v15 = vmul.f32 %v29_v11, %v23_v0 }
   0x9   :  { %50 = vadd.xlane.f32.xlu1 %v49_v8  ;;  %v61_v16 = vsel %vm39_vm0, %v30_v13, 0.0  ;;  %v32_v17 = vmul.f32 %v30_v13, %v24_v1 }
   0xa   :  { %v64_v18 = vsel %vm39_vm0, %v31_v15, 0.0  ;;  %v33_v19 = vmul.f32 %v31_v15, %v23_v0 }
   0xb   :  { %53 = vadd.xlane.f32.xlu0 %v52_v10  ;;  %v67_v20 = vsel %vm39_vm0, %v32_v17, 0.0  ;;  %v34_v21 = vmul.f32 %v32_v17, %v24_v1 }
   0xc   :  { %v70_v22 = vsel %vm39_vm0, %v33_v19, 0.0  ;;  %v35_v23 = vmul.f32 %v33_v19, %v23_v0 }
   0xd   :  { %56 = vadd.xlane.f32.xlu1 %v55_v12  ;;  %v73_v24 = vsel %vm39_vm0, %v34_v21, 0.0  ;;  %v36_v25 = vmul.f32 %v34_v21, %v24_v1  ;;  %v88_v21 = vld [vmem:[%s578_s2] sm:$0xff] }
   0xe   :  { %v76_v26 = vsel %vm39_vm0, %v35_v23, 0.0  ;;  %v37_v27 = vmul.f32 %v35_v23, %v23_v0  ;;  %457 = vmatprep.subr.mxu0 %v88_v21 }
   0xf   :  { %59 = vadd.xlane.f32.xlu0 %v58_v14  ;;  %v79_v28 = vsel %vm39_vm0, %v36_v25, 0.0  ;;  %v38_v29 = vmul.f32 %v36_v25, %v24_v1  ;;  %458 = vmatpush3.msra.mxu0 %v88_v21  ;;  %v324_v25 = vld [vmem:[%s579_s4 + $0x8] sm:$0xff] }
  0x10   :  { %v82_v30 = vsel %vm39_vm0, %v37_v27, 0.0  ;;  %v325_v27 = vld [vmem:[%s579_s4 + $0x10] sm:$0xff] }
  0x11   :  { %62 = vadd.xlane.f32.xlu1 %v61_v16  ;;  %v85_v31 = vsel %vm39_vm0, %v38_v29, 0.0 }
  0x13   :  { %65 = vadd.xlane.f32.xlu0 %v64_v18 }
  0x15   :  { %68 = vadd.xlane.f32.xlu1 %v67_v20 }
  0x17   :  { %71 = vadd.xlane.f32.xlu0 %v70_v22 }
  0x19   :  { %74 = vadd.xlane.f32.xlu1 %v73_v24  ;;  %v323_v24 = vld [vmem:[%s579_s4] sm:$0xff] }
  0x1b   :  { %77 = vadd.xlane.f32.xlu0 %v76_v26  ;;  %v473_v26 = vpack.c.bf16 %v324_v25, %v323_v24 }
  0x1d   :  { %80 = vadd.xlane.f32.xlu1 %v79_v28  ;;  %474 = vmatprep.subr.bf16.mxu1 %v473_v26  ;;  %v326_v28 = vld [vmem:[%s579_s4 + $0x18] sm:$0xff] }
  0x1e   :  { %476 = vmatpush3.bf16.msra.mxu1 %v473_v26  ;;  %v477_v29 = vpack.c.bf16 %v326_v28, %v325_v27 }
  0x1f   :  { %83 = vadd.xlane.f32.xlu0 %v82_v30 }
  0x20   :  { %478 = vmatprep.subr.bf16.mxu1 %v477_v29 }
  0x21   :  { %86 = vadd.xlane.f32.xlu1 %v85_v31  ;;  %v444_v31 = vld [vmem:[%s580_s3] ss:$0 sm:$0xff] }
  0x22   :  { %480 = vmatpush3.bf16.msra.mxu1 %v477_v29 }
  0x90   :  { %v42_v32 = vpop.xlane.xlu0 %41 }
  0x91   :  { %v110_v60 = vrot.slane %v42_v32, %v109_v46 }
  0x92   :  { %v48_v33 = vpop.xlane.xlu1 %47 }
  0x93   :  { %v121_v53 = vrot.slane %v48_v33, %v109_v46 }
  0x94   :  { %v45_v34 = vpop.xlane.xlu0 %44 }
  0x95   :  { %v115_v54 = vrot.slane %v45_v34, %v114_v47 }
  0x96   :  { %v51_v35 = vpop.xlane.xlu1 %50 }
  0x97   :  { %v125_v49 = vrot.slane %v51_v35, %v114_v47  ;;  %v117_v3 = vsel %vm116_vm1, %v115_v54, %v110_v60 }
  0x98   :  { %v54_v37 = vpop.xlane.xlu0 %53 }
  0x99   :  { %v130_v51 = vrot.slane %v54_v37, %v109_v46  ;;  %v126_v61 = vsel %vm116_vm1, %v125_v49, %v121_v53 }
  0x9a   :  { %v57_v38 = vpop.xlane.xlu1 %56  ;;  %v182_v6 = vsel %vm181_vm2, %v126_v61, %v117_v3 }
  0x9b   :  { %v134_v50 = vrot.slane %v57_v38, %v114_v47 }
  0x9c   :  { %v60_v40 = vpop.xlane.xlu0 %59 }
  0x9d   :  { %v139_v56 = vrot.slane %v60_v40, %v109_v46  ;;  %v135_v0 = vsel %vm116_vm1, %v134_v50, %v130_v51 }
  0x9e   :  { %v63_v41 = vpop.xlane.xlu1 %62  ;;  %v184_v9 = vsel %vm183_vm3, %v135_v0, %v182_v6 }
  0x9f   :  { %v143_v55 = vrot.slane %v63_v41, %v114_v47 }
  0xa0   :  { %v66_v44 = vpop.xlane.xlu0 %65 }
  0xa1   :  { %v148_v58 = vrot.slane %v66_v44, %v109_v46  ;;  %v144_v4 = vsel %vm116_vm1, %v143_v55, %v139_v56 }
  0xa2   :  { %v69_v45 = vpop.xlane.xlu1 %68  ;;  %v186_v12 = vsel %vm185_vm4, %v144_v4, %v184_v9 }
  0xa3   :  { %v152_v57 = vrot.slane %v69_v45, %v114_v47 }
  0xa4   :  { %v72_v48 = vpop.xlane.xlu0 %71 }
  0xa5   :  { %v157_v63 = vrot.slane %v72_v48, %v109_v46  ;;  %v153_v7 = vsel %vm116_vm1, %v152_v57, %v148_v58 }
  0xa6   :  { %v75_v52 = vpop.xlane.xlu1 %74  ;;  %v188_v16 = vsel %vm187_vm5, %v153_v7, %v186_v12 }
  0xa7   :  { %v161_v62 = vrot.slane %v75_v52, %v114_v47 }
  0xa8   :  { %v78_v59 = vpop.xlane.xlu0 %77 }
  0xa9   :  { %v166_v2 = vrot.slane %v78_v59, %v109_v46  ;;  %v162_v10 = vsel %vm116_vm1, %v161_v62, %v157_v63 }
  0xaa   :  { %v81_v1 = vpop.xlane.xlu1 %80  ;;  %v190_v17 = vsel %vm189_vm6, %v162_v10, %v188_v16 }
  0xab   :  { %v170_v5 = vrot.slane %v81_v1, %v114_v47 }
  0xac   :  { %v84_v8 = vpop.xlane.xlu0 %83 }
  0xad   :  { %v175_v11 = vrot.slane %v84_v8, %v109_v46  ;;  %v171_v14 = vsel %vm116_vm1, %v170_v5, %v166_v2 }
  0xae   :  { %v87_v13 = vpop.xlane.xlu1 %86  ;;  %v192_v19 = vsel %vm191_vm7, %v171_v14, %v190_v17 }
  0xaf   :  { %v179_v15 = vrot.slane %v87_v13, %v114_v47 }
  0xb1   :  { %v180_v18 = vsel %vm116_vm1, %v179_v15, %v175_v11 }
  0xb2   :  { %v194_v20 = vsel %vm193_vm8, %v180_v18, %v192_v19 }
  0xb3   :  { %196 = vxpose.xlu0.b32.start.end [1/1] (short) (narrow) %v194_v20, 16 }
 0x133   :  { %v212_v22 = vpop.trf.xlu0 }
 0x134   :  { %459 = vmatprep.mubr.msk.f32.mxu0 %vm228_vm9, %v212_v22 }
 0x137   :  { %v213_v23 = vpop.trf.xlu0 }
 0x138   :  { %460 = vmatmul.mubr.msk.f32.vlgmr.msra.gmra.mrb[0].mxu0 %vm228_vm9, %v213_v23 }
 0x20b   :  { %v461_v30 = vpop.f32.mrb[0].mxu0 }
 0x20c   :  { %v311_v32 = vmul.f32 0.015625, %v461_v30  ;;  %v301_v33 = vpop.f32.mrb[1].mxu0 }
 0x20d   :  { %v310_v34 = vmul.f32 0.015625, %v301_v33 }
 0x20e   :  { %v320_v35 = vadd.f32 %v444_v31, %v311_v32 }
 0x20f   :  { %v319_v36 = vadd.f32 %v444_v31, %v310_v34 }
 0x210   :  { %v322_v38 = vmax.f32 %v320_v35, 0.0 }
 0x211   :  { %v321_v37 = vmax.f32 %v319_v36, 0.0 }
 0x213   :  { %470 = vmatprep.mubr.msk.f32.mxu1 %vm334_vm10, %v321_v37 }
 0x214   :  { %471 = vmatmul.mubr.msk.f32.vlgmr.msra.gmra.mrb[0].mxu1 %vm334_vm10, %v322_v38 }
 0x2e7   :  { %v472_v40 = vpop.f32.mrb[0].mxu1 }
 0x2e8   :  { %v413_v41 = vadd.f32 %v472_v40, %v445_v39  ;;  %v407_v42 = vpop.f32.mrb[1].mxu1 }
 0x2e9   :  { %v408_v43 = vadd.f32 %v445_v39, %v407_v42 }
 0x2eb   :  { %v416_v44 = vsub.f32 %v408_v43, %v413_v41 }
 0x2ed   :  { %v417_v45 = vand.u32 2147483647, %v416_v44 }
 0x2ef   :  { %v418_v46 = vmul.f32 %v417_v45, %v417_v45 }
 0x2f1   :  { %v420_v47 = vsel %vm419_vm11, %v418_v46, 0.0 }
 0x2f2   :  { %421 = vadd.xlane.f32.xlu1 %v420_v47 }
 0x37f   :  { %v422_v48 = vpop.xlane.xlu1 %421 }
 0x380   :  { %482 = vrsqrt.f32 %v422_v48  ;;  %vm425_vm12 = vcmp.eq.f32.partialorder %v422_v48, inf  ;;  %v428_v51 = vand.u32 2147483648, %v422_v48  ;;  %vm427_vm13 = vcmp.eq.f32.partialorder %v422_v48, 0.0 }
 0x38a   :  { %v483_v49 = vpop.eup %482 }
 0x38b   :  { %v424_v50 = vmul.f32 %v483_v49, %v422_v48 }
 0x38d   :  { %v426_v52 = vsel %vm425_vm12, %v422_v48, %v424_v50 }
 0x38e   :  { %v429_v53 = vsel %vm427_vm13, %v428_v51, %v426_v52 }
 0x38f   :  { %v430_v54 = vsub.f32 0.0, %v429_v53 }
 0x391   :  { %v431_v55 = vmul.f32 1.442695, %v430_v54 }
 0x393   :  { %484 = vpow2.f32 %v431_v55 }
 0x39d   :  { %v485_v56 = vpop.eup %484 }
 0x39e   :  { %v433_v57 = vsub.f32 1.0, %v485_v56 }
 0x3a0   :  { %v435_v58 = vsel %vm434_vm14, %v485_v56, %v433_v57 }
 0x3a1   :  { %437 = vst.msk [vmem:[%s582_s6] sm:$0xff] %vm436_vm15, %v435_v58 }

</bundles_post_ra>
